<compile_context>
chip_gen: v7x
topology: tpu7x:2x2x1
jax: 0.10.0
libtpu: 0.0.40
codegen_flags: <defaults>
</compile_context>

<pallas_src>
import jax
import jax.numpy as jnp
from jax.experimental import pallas as pl
from jax.experimental.pallas import tpu as pltpu

STATE_DIM = 4     # CartPole-v1 observation_space.shape[0]
ACTION_DIM = 2    # CartPole-v1 action_space.n
DROP_P = 0.6


def policy_kernel(x_ref, w1_ref, wd_ref, drop_ref, o_ref):
    # x_ref:    (STATE_DIM, TB)   states, batch on the lane axis
    # w1_ref:   (H, STATE_DIM)    first-layer weight, PyTorch (out, in) layout
    # wd_ref:   (H, 1)            w2[0, :] - w2[1, :]  (logit-difference weights)
    # drop_ref: (H, TB)           inverted-dropout scale (keep/(1-p), or ones in eval)
    # o_ref:    (ACTION_DIM, TB)  action probabilities
    x = x_ref[...]
    w1 = w1_ref[...]

    # ----- Linear 1 (no bias), unrolled over the 4 state features on the VPU.
    # K=4 is far too small for the MXU to pay off; this avoids the MXU
    # round-trip entirely and is lane-dense in B.
    h = w1[:, 0:1] * x[0:1, :]
    for k in range(1, STATE_DIM):
        h = h + w1[:, k:k + 1] * x[k:k + 1, :]

    # ----- Dropout (precomputed inverted-dropout scale) then ReLU.
    # Scale is >= 0 so relu(dropout(h)) == dropout(relu(h)); one fused step.
    h = jnp.maximum(h * drop_ref[...], 0.0)

    # ----- Linear 2 reduced to the 2-class logit difference, then the
    # closed-form 2-class softmax (numerically stable sigmoid).
    d = jnp.sum(wd_ref[...] * h, axis=0, keepdims=True)        # (1, TB)
    e = jnp.exp(-jnp.abs(d))                                   # never overflows
    p_big = 1.0 / (1.0 + e)                                    # prob of larger logit
    p0 = jnp.where(d >= 0.0, p_big, 1.0 - p_big)               # P(action 0)
    o_ref[...] = jnp.concatenate([p0, 1.0 - p0], axis=0)       # (2, TB)


def policy_forward(x, w1, w2, *, dropout_key=None, training=True, block_b=128):
    """Forward pass of Policy.

    x : (B, STATE_DIM) float32          (PyTorch row layout)
    w1: (hidden, STATE_DIM) float32     (nn.Linear weight layout (out, in))
    w2: (ACTION_DIM, hidden) float32
    Returns (B, ACTION_DIM) action probabilities.
    """
    B = x.shape[0]
    H = w1.shape[0]
    TB = block_b
    B_pad = ((B + TB - 1) // TB) * TB
    n_blocks = B_pad // TB

    # Lane-dense layout: batch on lanes, features on sublanes (pad batch).
    x_t = jnp.zeros((STATE_DIM, B_pad), jnp.float32).at[:, :B].set(x.T)

    w1f = w1.astype(jnp.float32)                                    # (H, 4)
    wd = (w2[0, :] - w2[1, :]).astype(jnp.float32).reshape(H, 1)    # (H, 1)

    if training:
        if dropout_key is None:
            dropout_key = jax.random.PRNGKey(0)
        keep = jax.random.bernoulli(dropout_key, 1.0 - DROP_P, (H, B_pad))
        drop_scale = keep.astype(jnp.float32) * (1.0 / (1.0 - DROP_P))
    else:
        drop_scale = jnp.ones((H, B_pad), jnp.float32)

    out = pl.pallas_call(
        policy_kernel,
        out_shape=jax.ShapeDtypeStruct((ACTION_DIM, B_pad), jnp.float32),
        grid_spec=pl.GridSpec(
            grid=(n_blocks,),
            in_specs=[
                pl.BlockSpec((STATE_DIM, TB), lambda i: (0, i)),   # x_t tile
                pl.BlockSpec((H, STATE_DIM), lambda i: (0, 0)),    # w1 resident
                pl.BlockSpec((H, 1), lambda i: (0, 0)),            # wd resident
                pl.BlockSpec((H, TB), lambda i: (0, i)),           # dropout scale tile
            ],
            out_specs=pl.BlockSpec((ACTION_DIM, TB), lambda i: (0, i)),
        ),
        compiler_params=pltpu.CompilerParams(
            dimension_semantics=("parallel",)),
    )(x_t, w1f, wd, drop_scale)

    # Back to the PyTorch-facing (B, ACTION_DIM) layout.
    return out[:, :B].T


if __name__ == "__main__":
    hidden_dim = 32
    batch = 128   # lane-dense: one full 128-lane tile

    key = jax.random.PRNGKey(0)
    kx, kw1, kw2, kdrop = jax.random.split(key, 4)

    # PyTorch nn.Linear default-ish init, stored in (out_features, in_features).
    w1 = jax.random.uniform(kw1, (hidden_dim, STATE_DIM), jnp.float32,
                            minval=-1.0 / STATE_DIM ** 0.5,
                            maxval=1.0 / STATE_DIM ** 0.5)
    w2 = jax.random.uniform(kw2, (ACTION_DIM, hidden_dim), jnp.float32,
                            minval=-1.0 / hidden_dim ** 0.5,
                            maxval=1.0 / hidden_dim ** 0.5)
    x = jax.random.normal(kx, (batch, STATE_DIM), jnp.float32)

    # ---- eval-mode check (no dropout): exact against pure-JAX reference ----
    probs_eval = jax.block_until_ready(policy_forward(x, w1, w2, training=False))
    h_ref = jnp.maximum(x @ w1.T, 0.0)
    probs_ref = jax.nn.softmax(h_ref @ w2.T, axis=-1)
    assert probs_eval.shape == (batch, ACTION_DIM)
    assert bool(jnp.allclose(probs_eval, probs_ref, atol=1e-5))

    # ---- train-mode check: reproduce the same dropout mask in the reference ----
    probs_train = jax.block_until_ready(
        policy_forward(x, w1, w2, dropout_key=kdrop, training=True))
    TB = 128
    B_pad = ((batch + TB - 1) // TB) * TB
    keep = jax.random.bernoulli(kdrop, 1.0 - DROP_P, (hidden_dim, B_pad))
    scale = keep.astype(jnp.float32) * (1.0 / (1.0 - DROP_P))
    h_ref_t = jnp.maximum((x @ w1.T) * scale[:, :batch].T, 0.0)
    probs_ref_t = jax.nn.softmax(h_ref_t @ w2.T, axis=-1)
    assert probs_train.shape == (batch, ACTION_DIM)
    assert bool(jnp.allclose(probs_train, probs_ref_t, atol=1e-5))
    assert bool(jnp.allclose(jnp.sum(probs_train, axis=-1), 1.0, atol=1e-5))

    print("KERNEL_OK")
</pallas_src>

<mosaic_0001>
module attributes {stable_mosaic.version = 11 : i64} {
  func.func @policy_kernel(%arg0: i32, %arg1: memref<4x128xf32, #tpu.memory_space<vmem>>, %arg2: memref<32x4xf32, #tpu.memory_space<vmem>>, %arg3: memref<32x1xf32, #tpu.memory_space<vmem>>, %arg4: memref<32x128xf32, #tpu.memory_space<vmem>>, %arg5: memref<2x128xf32, #tpu.memory_space<vmem>>) attributes {dimension_semantics = [#tpu.dimension_semantics<parallel>], iteration_bounds = array<i64: 1>, scalar_prefetch = 0 : i64, scratch_operands = 0 : i64, tpu.core_type = #tpu.core_type<tc>, window_params = [{transform_indices = @transform_0, window_bounds = array<i64: 4, 128>}, {pipeline_mode = #tpu.pipeline_mode<synchronous>, transform_indices = @transform_1, window_bounds = array<i64: 32, 4>}, {pipeline_mode = #tpu.pipeline_mode<synchronous>, transform_indices = @transform_2, window_bounds = array<i64: 32, 1>}, {transform_indices = @transform_3, window_bounds = array<i64: 32, 128>}, {transform_indices = @transform_4, window_bounds = array<i64: 2, 128>}]} {
    %c0 = arith.constant 0 : index
    %c0_0 = arith.constant 0 : index
    %0 = vector.load %arg1[%c0, %c0_0] : memref<4x128xf32, #tpu.memory_space<vmem>>, vector<4x128xf32>
    %c0_1 = arith.constant 0 : index
    %c0_2 = arith.constant 0 : index
    %1 = vector.load %arg2[%c0_1, %c0_2] : memref<32x4xf32, #tpu.memory_space<vmem>>, vector<32x4xf32>
    %2 = vector.extract_strided_slice %1 {offsets = [0, 0], sizes = [32, 1], strides = [1, 1]} : vector<32x4xf32> to vector<32x1xf32>
    %3 = vector.extract_strided_slice %0 {offsets = [0, 0], sizes = [1, 128], strides = [1, 1]} : vector<4x128xf32> to vector<1x128xf32>
    %4 = vector.broadcast %2 : vector<32x1xf32> to vector<32x128xf32>
    %5 = vector.broadcast %3 : vector<1x128xf32> to vector<32x128xf32>
    %6 = arith.mulf %4, %5 : vector<32x128xf32>
    %7 = vector.extract_strided_slice %1 {offsets = [0, 1], sizes = [32, 1], strides = [1, 1]} : vector<32x4xf32> to vector<32x1xf32>
    %8 = vector.extract_strided_slice %0 {offsets = [1, 0], sizes = [1, 128], strides = [1, 1]} : vector<4x128xf32> to vector<1x128xf32>
    %9 = vector.broadcast %7 : vector<32x1xf32> to vector<32x128xf32>
    %10 = vector.broadcast %8 : vector<1x128xf32> to vector<32x128xf32>
    %11 = arith.mulf %9, %10 : vector<32x128xf32>
    %12 = arith.addf %6, %11 : vector<32x128xf32>
    %13 = vector.extract_strided_slice %1 {offsets = [0, 2], sizes = [32, 1], strides = [1, 1]} : vector<32x4xf32> to vector<32x1xf32>
    %14 = vector.extract_strided_slice %0 {offsets = [2, 0], sizes = [1, 128], strides = [1, 1]} : vector<4x128xf32> to vector<1x128xf32>
    %15 = vector.broadcast %13 : vector<32x1xf32> to vector<32x128xf32>
    %16 = vector.broadcast %14 : vector<1x128xf32> to vector<32x128xf32>
    %17 = arith.mulf %15, %16 : vector<32x128xf32>
    %18 = arith.addf %12, %17 : vector<32x128xf32>
    %19 = vector.extract_strided_slice %1 {offsets = [0, 3], sizes = [32, 1], strides = [1, 1]} : vector<32x4xf32> to vector<32x1xf32>
    %20 = vector.extract_strided_slice %0 {offsets = [3, 0], sizes = [1, 128], strides = [1, 1]} : vector<4x128xf32> to vector<1x128xf32>
    %21 = vector.broadcast %19 : vector<32x1xf32> to vector<32x128xf32>
    %22 = vector.broadcast %20 : vector<1x128xf32> to vector<32x128xf32>
    %23 = arith.mulf %21, %22 : vector<32x128xf32>
    %24 = arith.addf %18, %23 : vector<32x128xf32>
    %c0_3 = arith.constant 0 : index
    %c0_4 = arith.constant 0 : index
    %25 = vector.load %arg4[%c0_3, %c0_4] : memref<32x128xf32, #tpu.memory_space<vmem>>, vector<32x128xf32>
    %26 = arith.mulf %24, %25 : vector<32x128xf32>
    %cst = arith.constant 0.000000e+00 : f32
    %27 = vector.broadcast %cst : f32 to vector<32x128xf32>
    %28 = arith.maximumf %26, %27 : vector<32x128xf32>
    %c0_5 = arith.constant 0 : index
    %c0_6 = arith.constant 0 : index
    %29 = vector.load %arg3[%c0_5, %c0_6] : memref<32x1xf32, #tpu.memory_space<vmem>>, vector<32x1xf32>
    %30 = vector.broadcast %29 : vector<32x1xf32> to vector<32x128xf32>
    %31 = arith.mulf %30, %28 : vector<32x128xf32>
    %cst_7 = arith.constant dense<0.000000e+00> : vector<128xf32>
    %32 = vector.multi_reduction <add>, %31, %cst_7 [0] : vector<32x128xf32> to vector<128xf32>
    %33 = vector.shape_cast %32 : vector<128xf32> to vector<1x128xf32>
    %34 = math.absf %33 : vector<1x128xf32>
    %cst_8 = arith.constant 0.000000e+00 : f32
    %35 = vector.broadcast %cst_8 : f32 to vector<1x128xf32>
    %36 = arith.subf %35, %34 : vector<1x128xf32>
    %37 = math.exp %36 : vector<1x128xf32>
    %cst_9 = arith.constant 1.000000e+00 : f32
    %38 = vector.broadcast %cst_9 : f32 to vector<1x128xf32>
    %39 = arith.addf %38, %37 : vector<1x128xf32>
    %cst_10 = arith.constant 1.000000e+00 : f32
    %40 = vector.broadcast %cst_10 : f32 to vector<1x128xf32>
    %41 = arith.divf %40, %39 : vector<1x128xf32>
    %cst_11 = arith.constant 0.000000e+00 : f32
    %42 = vector.broadcast %cst_11 : f32 to vector<1x128xf32>
    %43 = arith.cmpf oge, %33, %42 : vector<1x128xf32>
    %cst_12 = arith.constant 1.000000e+00 : f32
    %44 = vector.broadcast %cst_12 : f32 to vector<1x128xf32>
    %45 = arith.subf %44, %41 : vector<1x128xf32>
    %46 = arith.select %43, %41, %45 : vector<1x128xi1>, vector<1x128xf32>
    %cst_13 = arith.constant 1.000000e+00 : f32
    %47 = vector.broadcast %cst_13 : f32 to vector<1x128xf32>
    %48 = arith.subf %47, %46 : vector<1x128xf32>
    %49 = tpu.concatenate %46, %48 in 0 : vector<1x128xf32>, vector<1x128xf32> -> vector<2x128xf32>
    %c0_14 = arith.constant 0 : index
    %c0_15 = arith.constant 0 : index
    %50 = vector.load %arg5[%c0_14, %c0_15] : memref<2x128xf32, #tpu.memory_space<vmem>>, vector<2x128xf32>
    tpu.vector_store %arg5[%c0_14, %c0_15], %49 {strides = array<i32>} : memref<2x128xf32, #tpu.memory_space<vmem>>, vector<2x128xf32>,
    return
  }
  func.func @transform_0(%arg0: i32) -> (i32, i32) {
    %c0_i32 = arith.constant 0 : i32
    %c0_i32_0 = arith.constant 0 : i32
    return %c0_i32, %arg0 : i32, i32
  }
  func.func @transform_1(%arg0: i32) -> (i32, i32) {
    %c0_i32 = arith.constant 0 : i32
    %c0_i32_0 = arith.constant 0 : i32
    %c0_i32_1 = arith.constant 0 : i32
    return %c0_i32, %c0_i32_0 : i32, i32
  }
  func.func @transform_2(%arg0: i32) -> (i32, i32) {
    %c0_i32 = arith.constant 0 : i32
    %c0_i32_0 = arith.constant 0 : i32
    %c0_i32_1 = arith.constant 0 : i32
    return %c0_i32, %c0_i32_0 : i32, i32
  }
  func.func @transform_3(%arg0: i32) -> (i32, i32) {
    %c0_i32 = arith.constant 0 : i32
    %c0_i32_0 = arith.constant 0 : i32
    return %c0_i32, %arg0 : i32, i32
  }
  func.func @transform_4(%arg0: i32) -> (i32, i32) {
    %c0_i32 = arith.constant 0 : i32
    %c0_i32_0 = arith.constant 0 : i32
    return %c0_i32, %arg0 : i32, i32
  }
}

</mosaic_0001>

<bundles_post_ra>
// kernel: tpu_custom_call.1
= control target key start
LH: loop header
LB: loop body
LE: loop exit
PB: predicated region body
PF: predicated region fallthrough
CT: control target
= control target key end

     0   :  { %v258_v1 = vmov 1   ;;  %v259_v2 = vmov 0   ;;  %s339_s0 = inlined_call_operand.vmem [shape: f32[4,128], index: 0, kind: input, shape index: {}]   ;;  %s340_s1 = inlined_call_operand.vmem [shape: f32[32,4], index: 1, kind: input, shape index: {}]   ;;  %s341_s2 = inlined_call_operand.vmem [shape: f32[32,1], index: 2, kind: input, shape index: {}]   ;;  %s342_s3 = inlined_call_operand.vmem [shape: f32[32,128], index: 3, kind: input, shape index: {}]   ;;  %s343_s4 = inlined_call_operand.hbm [shape: f32[2,128], index: 4, kind: output, shape index: {}]  }
   0x1   :  { %v19_v0 = vld [vmem:[%s340_s1] sm:$0xff]  ;;  %218 = vset.pattern.permute.xlu1 %v258_v1  ;;  %217 = vset.pattern.permute.xlu0 %v259_v2  ;;  %v20_v3 = vld [vmem:[%s340_s1 + $0x8] sm:$0xff] }
   0x2   :  { %52 = vperm.xlu1 %218, %v19_v0   ;;  %25 = vperm.xlu0 %217, %v19_v0  }
   0x3   :  { %9 = vsyncpa [#allocation3], 0  ;;  %v21_v4 = vld [vmem:[%s340_s1 + $0x10] sm:$0xff]  ;;  %v260_v5 = vmov 2   ;;  %v22_v6 = vld [vmem:[%s340_s1 + $0x18] sm:$0xff]  ;;  %v261_v7 = vmov 3   ;;  %v43_v17 = vlaneseq }
   0x4   :  { %v148_v8 = vld [vmem:[%s341_s2 + $0x8] sm:$0xff]  ;;  %v147_v9 = vld [vmem:[%s341_s2] sm:$0xff]  ;;  %v149_v10 = vld [vmem:[%s341_s2 + $0x10] sm:$0xff]  ;;  %vm195_vm1 = vcmask 1040384  }
   0x5   :  { %v150_v11 = vld [vmem:[%s341_s2 + $0x18] sm:$0xff]  ;;  %v44_v20 = vshrl.u32 %v43_v17, 7  ;;  %v18_v25 = vld [vmem:[%s339_s0] sm:$0xf]  ;;  %v136_v60 = vld [vmem:[%s342_s3 + $0x8] sm:$0xff] }
   0x6   :  { %56 = vperm.xlu1 %218, %v20_v3   ;;  %30 = vperm.xlu0 %217, %v20_v3   ;;  %v135_v61 = vld [vmem:[%s342_s3] sm:$0xff] }
   0x7   :  { %v69_v23 = vsub.s32 1, %v44_v20  ;;  %v45_v24 = vsub.s32 0, %v44_v20  ;;  %v97_v26 = vsub.s32 2, %v44_v20  ;;  %v125_v31 = vsub.s32 3, %v44_v20 }
   0x9   :  { %v70_v27 = vrot.slane %v18_v25, %v69_v23  ;;  %v46_v28 = vrot.slane %v18_v25, %v45_v24  ;;  %v98_v32 = vrot.slane %v18_v25, %v97_v26  ;;  %v126_v37 = vrot.slane %v18_v25, %v125_v31 }
   0xa   :  { %60 = vperm.xlu1 %218, %v21_v4   ;;  %35 = vperm.xlu0 %217, %v21_v4  }
   0xe   :  { %220 = vset.pattern.permute.xlu1 %v260_v5  ;;  %219 = vset.pattern.permute.xlu0 %v260_v5 }
   0xf   :  { %84 = vperm.xlu1 %220, %v20_v3   ;;  %80 = vperm.xlu0 %219, %v19_v0  }
  0x13   :  { %221 = vset.pattern.permute.xlu1 %v259_v2  ;;  %222 = vset.pattern.permute.xlu0 %v258_v1 }
  0x14   :  { %40 = vperm.xlu1 %221, %v22_v6   ;;  %64 = vperm.xlu0 %222, %v22_v6  }
  0x18   :  { %223 = vset.pattern.permute.xlu1 %v260_v5  ;;  %225 = vset.pattern.permute.xlu0 %v261_v7 }
  0x19   :  { %88 = vperm.xlu1 %223, %v21_v4   ;;  %112 = vperm.xlu0 %225, %v20_v3  }
  0x1d   :  { %224 = vset.pattern.permute.xlu1 %v261_v7  ;;  %120 = vperm.xlu0 %225, %v22_v6  }
  0x1e   :  { %108 = vperm.xlu1 %224, %v19_v0  }
  0x21   :  { %229 = vset.pattern.permute.xlu0 %v259_v2 }
  0x22   :  { %226 = vset.pattern.permute.xlu1 %v260_v5  ;;  %158 = vperm.xlu0 %229, %v148_v8   ;;  %v137_v5 = vld [vmem:[%s342_s3 + $0x10] sm:$0xff] }
  0x23   :  { %92 = vperm.xlu1 %226, %v22_v6  }
  0x27   :  { %227 = vset.pattern.permute.xlu1 %v261_v7 }
  0x28   :  { %116 = vperm.xlu1 %227, %v21_v4  }
  0x2c   :  { %228 = vset.pattern.permute.xlu1 %v259_v2 }
  0x2d   :  { %153 = vperm.xlu1 %228, %v147_v9  }
  0x31   :  { %163 = vperm.xlu1 %228, %v149_v10   ;;  %v138_v10 = vld [vmem:[%s342_s3 + $0x18] sm:$0xff]  ;;  %s262_s3 = smov [#allocation2]  }
  0x32   :  { %s204_s12 = sshll.u32 %s262_s3, 4  ;;  %s205_s12 = int_to_ptr.vmem [resolvable:$true] %s204_s12 }
  0x33   :  { %s234_s13 = scalar_lea.vmem %s205_s12, 32  ;;  %p239_p1 = scmp.lt.s32.totalorder %s205_s12, %s205_s12 }
  0x34   :  { %p235_p0 = scmp.ne.s32.totalorder %s205_s12, %s234_s13  ;;  %p240_p2 = scmp.lt.s32.totalorder %s234_s13, %s234_s13 }
  0x35   :  { %168 = vperm.xlu1 %228, %v150_v11  }
  0x36   :  { %p241_p3 = por %p240_p2, %p239_p1 }
  0x38   :  { %p242_p4 = pnand %p241_p3, %p235_p0 }
  0x81   :  { %v53_v12 = vpop.permute.xlu1 %52  ;;  %v26_v13 = vpop.permute.xlu0 %25 }
  0x82   :  { %v71_v33 = vmul.f32 %v70_v27, %v53_v12  ;;  %v47_v34 = vmul.f32 %v46_v28, %v26_v13 }
  0x84   :  { %v75_v42 = vadd.f32 %v71_v33, %v47_v34 }
  0x85   :  { %v57_v14 = vpop.permute.xlu1 %56  ;;  %v31_v15 = vpop.permute.xlu0 %30 }
  0x86   :  { %v72_v35 = vmul.f32 %v70_v27, %v57_v14  ;;  %v48_v36 = vmul.f32 %v46_v28, %v31_v15 }
  0x88   :  { %v76_v43 = vadd.f32 %v72_v35, %v48_v36 }
  0x89   :  { %v61_v16 = vpop.permute.xlu1 %60  ;;  %v36_v18 = vpop.permute.xlu0 %35 }
  0x8a   :  { %v73_v48 = vmul.f32 %v70_v27, %v61_v16  ;;  %v49_v49 = vmul.f32 %v46_v28, %v36_v18 }
  0x8c   :  { %v77_v58 = vadd.f32 %v73_v48, %v49_v49 }
  0x8e   :  { %v85_v19 = vpop.permute.xlu1 %84  ;;  %v81_v21 = vpop.permute.xlu0 %80 }
  0x8f   :  { %v100_v40 = vmul.f32 %v98_v32, %v85_v19  ;;  %v99_v41 = vmul.f32 %v98_v32, %v81_v21 }
  0x91   :  { %v104_v51 = vadd.f32 %v100_v40, %v76_v43  ;;  %v103_v52 = vadd.f32 %v99_v41, %v75_v42 }
  0x93   :  { %v41_v22 = vpop.permute.xlu1 %40  ;;  %v65_v29 = vpop.permute.xlu0 %64 }
  0x94   :  { %v50_v44 = vmul.f32 %v46_v28, %v41_v22  ;;  %v74_v45 = vmul.f32 %v70_v27, %v65_v29 }
  0x96   :  { %v78_v55 = vadd.f32 %v74_v45, %v50_v44 }
  0x98   :  { %v89_v30 = vpop.permute.xlu1 %88  ;;  %v113_v39 = vpop.permute.xlu0 %112 }
  0x99   :  { %v128_v46 = vmul.f32 %v126_v37, %v113_v39  ;;  %v101_v54 = vmul.f32 %v98_v32, %v89_v30 }
  0x9b   :  { %v132_v56 = vadd.f32 %v128_v46, %v104_v51  ;;  %v105_v1 = vadd.f32 %v101_v54, %v77_v58 }
  0x9c   :  { %v121_v59 = vpop.permute.xlu0 %120 }
  0x9d   :  { %v109_v38 = vpop.permute.xlu1 %108  ;;  %v130_v62 = vmul.f32 %v126_v37, %v121_v59  ;;  %v140_v3 = vmul.f32 %v136_v60, %v132_v56 }
  0x9e   :  { %v127_v47 = vmul.f32 %v126_v37, %v109_v38 }
  0x9f   :  { %v144_v11 = vmax.f32 %v140_v3, 0.0 }
  0xa0   :  { %v131_v57 = vadd.f32 %v127_v47, %v103_v52 }
  0xa1   :  { %v159_v13 = vpop.permute.xlu0 %158 }
  0xa2   :  { %v93_v50 = vpop.permute.xlu1 %92  ;;  %v139_v4 = vmul.f32 %v135_v61, %v131_v57  ;;  %v172_v18 = vmul.f32 %v159_v13, %v144_v11 }
  0xa3   :  { %v102_v53 = vmul.f32 %v98_v32, %v93_v50 }
  0xa4   :  { %v143_v12 = vmax.f32 %v139_v4, 0.0 }
  0xa5   :  { %v106_v63 = vadd.f32 %v102_v53, %v78_v55 }
  0xa7   :  { %v117_v0 = vpop.permute.xlu1 %116  ;;  %v134_v7 = vadd.f32 %v130_v62, %v106_v63 }
  0xa8   :  { %v129_v2 = vmul.f32 %v126_v37, %v117_v0 }
  0xa9   :  { %v142_v16 = vmul.f32 %v138_v10, %v134_v7 }
  0xaa   :  { %v133_v6 = vadd.f32 %v129_v2, %v105_v1 }
  0xab   :  { %v146_v21 = vmax.f32 %v142_v16, 0.0 }
  0xac   :  { %v154_v8 = vpop.permute.xlu1 %153  ;;  %v141_v9 = vmul.f32 %v137_v5, %v133_v6 }
  0xad   :  { %v171_v15 = vmul.f32 %v154_v8, %v143_v12 }
  0xae   :  { %v145_v14 = vmax.f32 %v141_v9, 0.0 }
  0xaf   :  { %v175_v20 = vadd.f32 %v172_v18, %v171_v15 }
  0xb0   :  { %v164_v17 = vpop.permute.xlu1 %163 }
  0xb1   :  { %v173_v19 = vmul.f32 %v164_v17, %v145_v14 }
  0xb3   :  { %v176_v23 = vadd.f32 %v175_v20, %v173_v19 }
  0xb4   :  { %v169_v22 = vpop.permute.xlu1 %168 }
  0xb5   :  { %v174_v24 = vmul.f32 %v169_v22, %v146_v21 }
  0xb7   :  { %v177_v25 = vadd.f32 %v176_v23, %v174_v24 }
  0xb9   :  { %v178_v26 = vrot.slane %v177_v25, 4 }
  0xbb   :  { %v179_v27 = vadd.f32 %v178_v26, %v177_v25 }
  0xbd   :  { %v180_v28 = vrot.slane %v179_v27, 2 }
  0xbf   :  { %v181_v29 = vadd.f32 %v180_v28, %v179_v27 }
  0xc1   :  { %v182_v30 = vrot.slane %v181_v29, 1 }
  0xc3   :  { %v183_v31 = vadd.f32 %v182_v30, %v181_v29 }
  0xc5   :  { %v184_v32 = vand.u32 2147483647, %v183_v31  ;;  %vm191_vm0 = vcmp.ge.f32.partialorder %v183_v31, 0.0 }
  0xc7   :  { %v185_v33 = vsub.f32 0.0, %v184_v32 }
  0xc9   :  { %v186_v34 = vmul.f32 1.442695, %v185_v33 }
  0xcb   :  { %230 = vpow2.f32 %v186_v34 }
  0xd5   :  { %v231_v35 = vpop.eup %230 }
  0xd6   :  { %v188_v36 = vadd.f32 1.0, %v231_v35 }
  0xd8   :  { %232 = vrcp.f32 %v188_v36 }
  0xe2   :  { %v233_v37 = vpop.eup %232 }
  0xe3   :  { %v192_v38 = vsub.f32 1.0, %v233_v37 }
  0xe5   :  { %v193_v39 = vsel %vm191_vm0, %v233_v37, %v192_v38 }
  0xe6   :  { %v194_v40 = vsub.f32 1.0, %v193_v39 }
  0xe8   :  { %v196_v41 = vsel %vm195_vm1, %v193_v39, %v194_v40 }
  0xe9   :  { %197 = vst [vmem:[#allocation2] sm:$0x3] %v196_v41 }
  0xea   :  { %245 = shalt.err (!%p242_p4)
}
  0xeb   :  { %s246_s16 = scalar_lea.hbm %s343_s4, 32 }
  0xec   :  { %p247_p5 = scmp.ne.s32.totalorder %s343_s4, %s246_s16  ;;  %p250_p6 = scmp.lt.u32.totalorder %s246_s16, %s343_s4 }
  0xee   :  { %p252_p7 = pnand %p250_p6, %p247_p5 }
  0xf0   :  { %255 = shalt.err (!%p252_p7)
}
  0xf1   :  { %207 = dma.vmem_to_hbm [thread:$0]  %s205_s12, 32, %s343_s4, [#allocation3]  }
  0xf2   :  { %256 = dma.done.wait [#allocation3], 32  }
  0xf3   :  { %257 = vsyncadd [#allocation3], 4294967264 }
  0xf4   :  { %211 = vsyncpa [#allocation3], 1 }

</bundles_post_ra>
